<compile_context>
chip_gen: v5e
topology: v5e:2x2
jax: 0.10.0
libtpu: 0.0.40
codegen_flags: <defaults>
</compile_context>

<pallas_src>
import functools

import jax
import jax.numpy as jnp
from jax.experimental import pallas as pl
from jax.experimental.pallas import tpu as pltpu

_SUB = 8                               # f32 sublanes per vreg
_LANE = 128                            # lanes per vreg
_STRIP_ROWS = 512                      # inner-loop strip: ~256 KiB per f32 temp
_TARGET_STEP_BYTES = 4 * 1024 * 1024   # x + t HBM bytes per grid step


def _min_sublanes(dtype):
    """Minimum sublane multiple for a dtype's native tiling (f32:8, bf16:16, int8:32)."""
    return _SUB * max(1, 4 // jnp.dtype(dtype).itemsize)


def _pick_strip_rows(block_rows, sub_req):
    """Largest strip <= _STRIP_ROWS that is a multiple of sub_req and divides block_rows."""
    cap = min(_STRIP_ROWS, block_rows)
    cap -= cap % sub_req
    for s in range(cap, 0, -sub_req):
        if block_rows % s == 0:
            return s
    return block_rows  # tiny / oddly-shaped full-array block: single strip


def _focal_loss_kernel(x_ref, t_ref, out_ref, *, alpha, gamma, tail_valid,
                       has_tail, strip_rows):
    block_rows = x_ref.shape[0]
    num_strips = block_rows // strip_rows

    def strip_loss(r0):
        # Load + cast one strip; temps are (strip_rows, 128) f32 regardless of block size.
        x = x_ref[pl.ds(r0, strip_rows), :].astype(jnp.float32)
        t = t_ref[pl.ds(r0, strip_rows), :].astype(jnp.float32)

        # Numerically-stable BCE-with-logits (== F.binary_cross_entropy_with_logits):
        #   bce = max(x, 0) - x*t + log1p(exp(-|x|))
        bce = jnp.maximum(x, 0.0) - x * t + jnp.log1p(jnp.exp(-jnp.abs(x)))

        # pt = exp(-bce): matches the reference exactly; trades the divide + select
        # chain of the sigmoid formulation for one EUP exp (EUP slot has slack).
        pt = jnp.exp(-bce)

        # at = alpha.gather(0, targets) with alpha = [alpha, 1 - alpha]; branch-free
        # for hard 0/1 targets:  t=0 -> alpha, t=1 -> 1-alpha.
        at = alpha + (1.0 - 2.0 * alpha) * t

        om = 1.0 - pt
        if gamma == 1.5:
            fw = om * jnp.sqrt(om)      # avoid exp/log pair from non-integer pow
        elif gamma == 2.0:
            fw = om * om
        elif gamma == 1.0:
            fw = om
        elif gamma == 0.0:
            fw = jnp.ones_like(om)
        else:
            fw = jnp.power(om, gamma)

        return at * fw * bce

    def strip_partial(r0, masked):
        f_loss = strip_loss(r0)
        if masked:
            # Block-local flat element index (int32 safe: < block_rows*128 << 2^31).
            local = ((jax.lax.broadcasted_iota(jnp.int32, f_loss.shape, 0) + r0)
                     * _LANE
                     + jax.lax.broadcasted_iota(jnp.int32, f_loss.shape, 1))
            # where-select (NOT a multiply): NaN/Inf garbage in the padded / OOB
            # region must be discarded, never propagated.
            f_loss = jnp.where(local < tail_valid, f_loss, 0.0)
        # (strip_rows,128) -> (strip_rows//8, 8, 128) -> pure elementwise vreg adds.
        return f_loss.reshape(-1, _SUB, _LANE).sum(axis=0)

    def run(masked):
        out_ref[...] = strip_partial(0, masked)
        if num_strips > 1:
            @pl.loop(1, num_strips)
            def _(s):
                r0 = pl.multiple_of(s * strip_rows, strip_rows)
                out_ref[...] += strip_partial(r0, masked)

    if has_tail:
        is_last = pl.program_id(0) == pl.num_programs(0) - 1

        @pl.when(is_last)
        def _():
            run(True)

        @pl.when(jnp.logical_not(is_last))
        def _():
            run(False)
    else:
        run(False)


def focal_loss(inputs, targets, alpha=0.25, gamma=1.5, block_rows=None,
               target_step_bytes=_TARGET_STEP_BYTES):
    """Mean focal loss over all elements (logits=True), matching the PyTorch module."""
    x = inputs.reshape(-1)
    t = targets.reshape(-1)
    if t.dtype == jnp.bool_:
        t = t.astype(jnp.int8)        # keep targets narrow; cast to f32 in-kernel
    n = x.shape[0]

    # Pad (only when needed) to a multiple of one (8,128) vreg so the flat arrays
    # reshape to a lane-dense (rows, 128) slab with rows % 8 == 0.
    tile = _SUB * _LANE
    n_pad = int(pl.cdiv(n, tile)) * tile
    if n_pad != n:
        x = jnp.pad(x, (0, n_pad - n))
        t = jnp.pad(t, (0, n_pad - n))

    rows = n_pad // _LANE
    x2 = x.reshape(rows, _LANE)
    t2 = t.reshape(rows, _LANE)

    sub_req = max(_min_sublanes(x2.dtype), _min_sublanes(t2.dtype))

    if block_rows is None:
        # Keep per-step HBM bytes ~constant across dtypes (narrow dtypes get more
        # rows), rounded to the strip size so the inner loop tiles evenly.
        bytes_per_row = _LANE * (x2.dtype.itemsize + t2.dtype.itemsize)
        block_rows = max(_STRIP_ROWS,
                         (target_step_bytes // bytes_per_row)
                         // _STRIP_ROWS * _STRIP_ROWS)
    if block_rows >= rows:
        block_rows = rows            # full array: (8,128) divisibility waived
    else:
        block_rows = max(sub_req, (block_rows // sub_req) * sub_req)

    strip_rows = _pick_strip_rows(block_rows, sub_req)

    block_elems = block_rows * _LANE
    num_blocks = int(pl.cdiv(rows, block_rows))

    # Number of *valid* (unpadded, in-bounds) elements inside the last block.
    tail_valid = n - (num_blocks - 1) * block_elems
    has_tail = tail_valid != block_elems

    kernel = functools.partial(
        _focal_loss_kernel,
        alpha=float(alpha), gamma=float(gamma),
        tail_valid=int(tail_valid), has_tail=bool(has_tail),
        strip_rows=int(strip_rows))

    # VMEM budget: 2 inputs x 2 pipeline buffers x one block + strip temporaries
    # + headroom; >= 32 MiB, capped at 64 MiB (v7x physical VMEM per TC).
    in_bytes = 2 * block_rows * _LANE * (x2.dtype.itemsize + t2.dtype.itemsize)
    temp_bytes = 16 * strip_rows * _LANE * 4
    vmem_limit = int(min(64 << 20, max(32 << 20, in_bytes + temp_bytes + (8 << 20))))

    partials = pl.pallas_call(
        kernel,
        out_shape=jax.ShapeDtypeStruct((num_blocks * _SUB, _LANE), jnp.float32),
        grid=(num_blocks,),
        in_specs=[
            pl.BlockSpec((block_rows, _LANE), lambda i: (i, 0)),
            pl.BlockSpec((block_rows, _LANE), lambda i: (i, 0)),
        ],
        out_specs=pl.BlockSpec((_SUB, _LANE), lambda i: (i, 0)),
        compiler_params=pltpu.CompilerParams(
            # No carried state -> grid axis is megacore-shardable (v7x 2 TCs).
            dimension_semantics=("parallel",),
            vmem_limit_bytes=vmem_limit),
    )(x2, t2)

    # Tiny final reduction (num_blocks * 8 * 128 f32) + mean.
    return jnp.sum(partials) / jnp.float32(n)


def _focal_loss_ref(inputs, targets, alpha=0.25, gamma=1.5):
    x = inputs.reshape(-1).astype(jnp.float32)
    t = targets.reshape(-1).astype(jnp.float32)
    bce = jnp.maximum(x, 0.0) - x * t + jnp.log1p(jnp.exp(-jnp.abs(x)))
    at = jnp.where(t > 0.5, 1.0 - alpha, alpha)
    pt = jnp.exp(-bce)
    return jnp.mean(at * (1.0 - pt) ** gamma * bce)


if __name__ == "__main__":
    key = jax.random.PRNGKey(0)
    ks = jax.random.split(key, 8)

    # Case 1: NCHW f32 logits + binary f32 mask (single block & strip, no padding).
    x1 = jax.random.normal(ks[0], (2, 4, 16, 16), dtype=jnp.float32)
    t1 = (jax.random.uniform(ks[1], (2, 4, 16, 16)) > 0.5).astype(jnp.float32)
    out1, ref1 = focal_loss(x1, t1), _focal_loss_ref(x1, t1)

    # Case 2: ragged element count -> exercises the last-block padding mask.
    x2 = jax.random.normal(ks[2], (3, 5, 17, 13), dtype=jnp.float32)
    t2 = (jax.random.uniform(ks[3], (3, 5, 17, 13)) > 0.5).astype(jnp.float32)
    out2, ref2 = focal_loss(x2, t2), _focal_loss_ref(x2, t2)

    # Case 3: multi-block grid (small block_rows) along the "parallel" axis.
    out3, ref3 = focal_loss(x1, t1, block_rows=8), ref1

    # Case 4: narrow dtypes (bf16 logits, bool targets) cast to f32 inside the kernel.
    x4 = x1.astype(jnp.bfloat16)
    t4 = t1 > 0.5
    out4 = focal_loss(x4, t4)
    ref4 = _focal_loss_ref(x4.astype(jnp.float32), t4.astype(jnp.float32))

    # Case 5: larger ragged input -> single block, multi-strip inner loop, tail mask
    # with dynamic (traced) strip offsets.
    x5 = jax.random.normal(ks[4], (2, 3, 211, 211), dtype=jnp.float32)
    t5 = (jax.random.uniform(ks[5], (2, 3, 211, 211)) > 0.5).astype(jnp.float32)
    out5, ref5 = focal_loss(x5, t5), _focal_loss_ref(x5, t5)

    # Case 6: multi-block grid AND multi-strip inner loop, no tail.
    x6 = jax.random.normal(ks[6], (2, 8, 128, 128), dtype=jnp.float32)
    t6 = (jax.random.uniform(ks[7], (2, 8, 128, 128)) > 0.5).astype(jnp.float32)
    out6, ref6 = focal_loss(x6, t6, block_rows=1024), _focal_loss_ref(x6, t6)

    jax.block_until_ready((out1, out2, out3, out4, out5, out6))

    assert jnp.allclose(out1, ref1, rtol=1e-5, atol=1e-5), (out1, ref1)
    assert jnp.allclose(out2, ref2, rtol=1e-5, atol=1e-5), (out2, ref2)
    assert jnp.allclose(out3, ref3, rtol=1e-5, atol=1e-5), (out3, ref3)
    assert jnp.allclose(out4, ref4, rtol=1e-5, atol=1e-5), (out4, ref4)
    assert jnp.allclose(out5, ref5, rtol=1e-5, atol=1e-5), (out5, ref5)
    assert jnp.allclose(out6, ref6, rtol=1e-5, atol=1e-5), (out6, ref6)

    print("KERNEL_OK")
</pallas_src>

<mosaic_0001>
module attributes {stable_mosaic.version = 11 : i64} {
  func.func @_focal_loss_kernel(%arg0: i32, %arg1: memref<16x128xf32, #tpu.memory_space<vmem>>, %arg2: memref<16x128xf32, #tpu.memory_space<vmem>>, %arg3: memref<8x128xf32, #tpu.memory_space<vmem>>) attributes {dimension_semantics = [#tpu.dimension_semantics<parallel>], iteration_bounds = array<i64: 1>, scalar_prefetch = 0 : i64, scratch_operands = 0 : i64, tpu.core_type = #tpu.core_type<tc>, window_params = [{transform_indices = @transform_0, window_bounds = array<i64: 16, 128>}, {transform_indices = @transform_1, window_bounds = array<i64: 16, 128>}, {transform_indices = @transform_2, window_bounds = array<i64: 8, 128>}]} {
    %c0 = arith.constant 0 : index
    %c0_0 = arith.constant 0 : index
    %0 = vector.load %arg1[%c0, %c0_0] : memref<16x128xf32, #tpu.memory_space<vmem>>, vector<16x128xf32>
    %c0_1 = arith.constant 0 : index
    %c0_2 = arith.constant 0 : index
    %1 = vector.load %arg2[%c0_1, %c0_2] : memref<16x128xf32, #tpu.memory_space<vmem>>, vector<16x128xf32>
    %cst = arith.constant 0.000000e+00 : f32
    %2 = vector.broadcast %cst : f32 to vector<16x128xf32>
    %3 = arith.maximumf %0, %2 : vector<16x128xf32>
    %4 = arith.mulf %0, %1 : vector<16x128xf32>
    %5 = arith.subf %3, %4 : vector<16x128xf32>
    %6 = math.absf %0 : vector<16x128xf32>
    %cst_3 = arith.constant 0.000000e+00 : f32
    %7 = vector.broadcast %cst_3 : f32 to vector<16x128xf32>
    %8 = arith.subf %7, %6 : vector<16x128xf32>
    %9 = math.exp %8 : vector<16x128xf32>
    %10 = math.log1p %9 : vector<16x128xf32>
    %11 = arith.addf %5, %10 : vector<16x128xf32>
    %cst_4 = arith.constant 0.000000e+00 : f32
    %12 = vector.broadcast %cst_4 : f32 to vector<16x128xf32>
    %13 = arith.subf %12, %11 : vector<16x128xf32>
    %14 = math.exp %13 : vector<16x128xf32>
    %cst_5 = arith.constant 5.000000e-01 : f32
    %15 = vector.broadcast %cst_5 : f32 to vector<16x128xf32>
    %16 = arith.mulf %15, %1 : vector<16x128xf32>
    %cst_6 = arith.constant 2.500000e-01 : f32
    %17 = vector.broadcast %cst_6 : f32 to vector<16x128xf32>
    %18 = arith.addf %17, %16 : vector<16x128xf32>
    %cst_7 = arith.constant 1.000000e+00 : f32
    %19 = vector.broadcast %cst_7 : f32 to vector<16x128xf32>
    %20 = arith.subf %19, %14 : vector<16x128xf32>
    %21 = math.sqrt %20 : vector<16x128xf32>
    %22 = arith.mulf %20, %21 : vector<16x128xf32>
    %23 = arith.mulf %18, %22 : vector<16x128xf32>
    %24 = arith.mulf %23, %11 : vector<16x128xf32>
    %25 = vector.shape_cast %24 : vector<16x128xf32> to vector<2x8x128xf32>
    %cst_8 = arith.constant dense<0.000000e+00> : vector<8x128xf32>
    %26 = vector.multi_reduction <add>, %25, %cst_8 [0] : vector<2x8x128xf32> to vector<8x128xf32>
    %c0_9 = arith.constant 0 : index
    %c0_10 = arith.constant 0 : index
    %27 = vector.load %arg3[%c0_9, %c0_10] : memref<8x128xf32, #tpu.memory_space<vmem>>, vector<8x128xf32>
    tpu.vector_store %arg3[%c0_9, %c0_10], %26 {strides = array<i32>} : memref<8x128xf32, #tpu.memory_space<vmem>>, vector<8x128xf32>,
    return
  }
  func.func @transform_0(%arg0: i32) -> (i32, i32) {
    %c0_i32 = arith.constant 0 : i32
    %c0_i32_0 = arith.constant 0 : i32
    return %arg0, %c0_i32 : i32, i32
  }
  func.func @transform_1(%arg0: i32) -> (i32, i32) {
    %c0_i32 = arith.constant 0 : i32
    %c0_i32_0 = arith.constant 0 : i32
    return %arg0, %c0_i32 : i32, i32
  }
  func.func @transform_2(%arg0: i32) -> (i32, i32) {
    %c0_i32 = arith.constant 0 : i32
    %c0_i32_0 = arith.constant 0 : i32
    return %arg0, %c0_i32 : i32, i32
  }
}

</mosaic_0001>

<bundles_post_ra>
// kernel: tpu_custom_call.1
= control target key start
LH: loop header
LB: loop body
LE: loop exit
PB: predicated region body
PF: predicated region fallthrough
CT: control target
= control target key end

     0   :  { %7 = vsyncpa [#allocation3], 0  ;;  %s272_s0 = inlined_call_operand.hbm [shape: f32[16,128], index: 0, kind: input, shape index: {}]   ;;  %s273_s1 = inlined_call_operand.hbm [shape: f32[16,128], index: 1, kind: input, shape index: {}]   ;;  %s274_s2 = inlined_call_operand.hbm [shape: f32[8,128], index: 2, kind: output, shape index: {}]  }
   0x1   :  { %8 = vsyncpa [#allocation6], 0 }
   0x2   :  { %9 = vsyncpa [#allocation4], 0  ;;  %s14_s11 = sshll.u32 %s272_s0, 4  ;;  %s243_s12 = smov [#allocation2]   ;;  %s15_s11 = int_to_ptr.hbm [resolvable:$true] %s14_s11 }
   0x3   :  { %s16_s13 = sshll.u32 %s243_s12, 4  ;;  %s27_s16 = sshll.u32 %s273_s1, 4  ;;  %s17_s13 = int_to_ptr.vmem [resolvable:$true] %s16_s13  ;;  %s28_s16 = int_to_ptr.hbm [resolvable:$true] %s27_s16 }
   0x4   :  { %s244_s17 = smov 128   ;;  %s245_s18 = smov 8  }
   0x5   :  { %22 = dma.hbm_to_vmem [thread:$0]  %s15_s11, 256, %s17_s13, [#allocation3], %s244_s17, %s244_s17, %s245_s18  }
   0x6   :  { %s246_s19 = smov [#allocation5]  }
   0x7   :  { %s29_s20 = sshll.u32 %s246_s19, 4  ;;  %s30_s20 = int_to_ptr.vmem [resolvable:$true] %s29_s20 }
   0x8   :  { %35 = dma.hbm_to_vmem [thread:$0]  %s28_s16, 256, %s30_s20, [#allocation6], %s244_s17, %s244_s17, %s245_s18  }
   0x9   :  { %237 = dma.done.wait [#allocation3], 256  }
   0xa   :  { %238 = vsyncadd [#allocation3], 4294967040 }
   0xb   :  { %239 = dma.done.wait [#allocation6], 256  }
   0xc   :  { %240 = vsyncadd [#allocation6], 4294967040  ;;  %v44_v0 = vld [vmem:[#allocation2] sm:$0xff]  ;;  %v45_v1 = vld [vmem:[#allocation2 + $0x8] sm:$0xff]  ;;  %s247_s0 = smov [#allocation7]   ;;  %s133_s23 = sshll.u32 %s274_s2, 4  ;;  %s134_s23 = int_to_ptr.hbm [resolvable:$true] %s133_s23 }
   0xd   :  { %v54_v2 = vand.u32 2147483647, %v44_v0  ;;  %v55_v3 = vand.u32 2147483647, %v45_v1  ;;  %v46_v12 = vld [vmem:[#allocation5] sm:$0xff]  ;;  %v47_v15 = vld [vmem:[#allocation5 + $0x8] sm:$0xff] }
   0xe   :  { %v48_v17 = vmax.f32 %v44_v0, 0.0  ;;  %v50_v18 = vmul.f32 %v46_v12, %v44_v0  ;;  %v49_v21 = vmax.f32 %v45_v1, 0.0  ;;  %v51_v22 = vmul.f32 %v47_v15, %v45_v1  ;;  %s131_s1 = sshll.u32 %s247_s0, 4  ;;  %s132_s1 = int_to_ptr.vmem [resolvable:$true] %s131_s1 }
   0xf   :  { %v56_v4 = vsub.f32 0.0, %v54_v2  ;;  %v57_v5 = vsub.f32 0.0, %v55_v3  ;;  %v88_v54 = vmul.f32 0.5, %v46_v12  ;;  %v89_v56 = vmul.f32 0.5, %v47_v15 }
  0x10   :  { %v52_v26 = vsub.f32 %v48_v17, %v50_v18  ;;  %v53_v29 = vsub.f32 %v49_v21, %v51_v22 }
  0x11   :  { %v58_v6 = vmul.f32 1.442695, %v56_v4  ;;  %v60_v7 = vmul.f32 1.442695, %v57_v5  ;;  %v90_v62 = vadd.f32 0.25, %v88_v54  ;;  %v91_v0 = vadd.f32 0.25, %v89_v56 }
  0x13   :  { %149 = vpow2.f32 %v58_v6 }
  0x14   :  { %151 = vpow2.f32 %v60_v7 }
  0x19   :  { %v150_v8 = vpop.eup %149 }
  0x1a   :  { %v152_v9 = vpop.eup %151  ;;  %v62_v10 = vadd.f32 1.0, %v150_v8  ;;  %v65_v11 = vmul.f32 -0.5, %v150_v8  ;;  %v68_v19 = vand.u32 2147483647, %v150_v8 }
  0x1b   :  { %v71_v13 = vadd.f32 1.0, %v152_v9  ;;  %v74_v14 = vmul.f32 -0.5, %v152_v9  ;;  %v77_v23 = vand.u32 2147483647, %v152_v9 }
  0x1c   :  { %153 = vlog2.f32 %v62_v10  ;;  %v66_v16 = vadd.f32 1.0, %v65_v11  ;;  %vm69_vm0 = vcmp.lt.f32.partialorder %v68_v19, 0.0004427343 }
  0x1d   :  { %155 = vlog2.f32 %v71_v13  ;;  %v75_v20 = vadd.f32 1.0, %v74_v14  ;;  %vm78_vm1 = vcmp.lt.f32.partialorder %v77_v23, 0.0004427343 }
  0x1e   :  { %v67_v24 = vmul.f32 %v150_v8, %v66_v16 }
  0x1f   :  { %v76_v27 = vmul.f32 %v152_v9, %v75_v20 }
  0x22   :  { %v154_v25 = vpop.eup %153 }
  0x23   :  { %v156_v28 = vpop.eup %155  ;;  %v64_v30 = vmul.f32 0.6931472, %v154_v25 }
  0x24   :  { %v73_v31 = vmul.f32 0.6931472, %v156_v28 }
  0x25   :  { %v70_v32 = vsel %vm69_vm0, %v67_v24, %v64_v30 }
  0x26   :  { %v79_v33 = vsel %vm78_vm1, %v76_v27, %v73_v31  ;;  %v80_v34 = vadd.f32 %v70_v32, %v52_v26 }
  0x27   :  { %v81_v35 = vadd.f32 %v79_v33, %v53_v29 }
  0x28   :  { %v82_v36 = vsub.f32 0.0, %v80_v34 }
  0x29   :  { %v83_v37 = vsub.f32 0.0, %v81_v35 }
  0x2a   :  { %v84_v38 = vmul.f32 1.442695, %v82_v36 }
  0x2b   :  { %v86_v39 = vmul.f32 1.442695, %v83_v37 }
  0x2c   :  { %157 = vpow2.f32 %v84_v38 }
  0x2d   :  { %159 = vpow2.f32 %v86_v39 }
  0x32   :  { %v158_v40 = vpop.eup %157 }
  0x33   :  { %v160_v41 = vpop.eup %159  ;;  %v92_v42 = vsub.f32 1.0, %v158_v40 }
  0x34   :  { %v93_v43 = vsub.f32 1.0, %v160_v41 }
  0x35   :  { %161 = vrsqrt.f32 %v92_v42  ;;  %vm101_vm2 = vcmp.eq.f32.partialorder %v92_v42, inf  ;;  %v104_v57 = vand.u32 2147483648, %v92_v42  ;;  %vm103_vm3 = vcmp.eq.f32.partialorder %v92_v42, 0.0 }
  0x36   :  { %163 = vrsqrt.f32 %v93_v43  ;;  %vm113_vm4 = vcmp.eq.f32.partialorder %v93_v43, inf  ;;  %v116_v60 = vand.u32 2147483648, %v93_v43  ;;  %vm115_vm5 = vcmp.eq.f32.partialorder %v93_v43, 0.0 }
  0x3b   :  { %v162_v44 = vpop.eup %161 }
  0x3c   :  { %v164_v45 = vpop.eup %163  ;;  %v95_v46 = vmul.f32 %v162_v44, %v92_v42 }
  0x3d   :  { %v107_v47 = vmul.f32 %v164_v45, %v93_v43 }
  0x3e   :  { %v96_v48 = vmul.f32 %v162_v44, %v95_v46 }
  0x3f   :  { %v108_v49 = vmul.f32 %v164_v45, %v107_v47 }
  0x40   :  { %v97_v50 = vmul.f32 0.5, %v96_v48 }
  0x41   :  { %v109_v51 = vmul.f32 0.5, %v108_v49 }
  0x42   :  { %v98_v52 = vsub.f32 1.5, %v97_v50 }
  0x43   :  { %v110_v53 = vsub.f32 1.5, %v109_v51 }
  0x44   :  { %v99_v55 = vmul.f32 %v162_v44, %v98_v52 }
  0x45   :  { %v111_v58 = vmul.f32 %v164_v45, %v110_v53 }
  0x46   :  { %v100_v59 = vmul.f32 %v99_v55, %v92_v42 }
  0x47   :  { %v112_v61 = vmul.f32 %v111_v58, %v93_v43 }
  0x48   :  { %v102_v63 = vsel %vm101_vm2, %v92_v42, %v100_v59 }
  0x49   :  { %v105_v1 = vsel %vm103_vm3, %v104_v57, %v102_v63  ;;  %v114_v2 = vsel %vm113_vm4, %v93_v43, %v112_v61 }
  0x4a   :  { %v117_v3 = vsel %vm115_vm5, %v116_v60, %v114_v2  ;;  %v118_v4 = vmul.f32 %v105_v1, %v92_v42 }
  0x4b   :  { %v119_v5 = vmul.f32 %v117_v3, %v93_v43 }
  0x4c   :  { %v120_v6 = vmul.f32 %v118_v4, %v90_v62 }
  0x4d   :  { %v121_v7 = vmul.f32 %v119_v5, %v91_v0 }
  0x4e   :  { %v122_v8 = vmul.f32 %v120_v6, %v80_v34 }
  0x4f   :  { %v123_v9 = vmul.f32 %v121_v7, %v81_v35 }
  0x51   :  { %v124_v10 = vadd.f32 %v123_v9, %v122_v8 }
  0x53   :  { %125 = vst [vmem:[#allocation7] sm:$0xff] %v124_v10 }
  0x54   :  { %136 = dma.vmem_to_hbm [thread:$0]  %s132_s1, 128, %s134_s23, [#allocation4]  }
  0x55   :  { %241 = dma.done.wait [#allocation4], 128  }
  0x56   :  { %242 = vsyncadd [#allocation4], 4294967168 }
  0x57   :  { %141 = vsyncpa [#allocation3], 1 }
  0x58   :  { %142 = vsyncpa [#allocation6], 1 }
  0x59   :  { %143 = vsyncpa [#allocation4], 1 }

</bundles_post_ra>
